<compile_context>
chip_gen: v5e
topology: v5e:2x2
jax: 0.10.0
libtpu: 0.0.40
codegen_flags: <defaults>
</compile_context>

<pallas_src>
import functools
import numpy as np
import jax
import jax.numpy as jnp
from jax.experimental import pallas as pl
from jax.experimental.pallas import tpu as pltpu


# ----------------------------- Pallas kernel --------------------------------
def hh_attention_kernel(x_ref,        # (Bt, N, E)  activations (mxu dtype)
                        bias_ref,     # (1, S, S)   additive mask bias, f32 (S = Bt*N)
                        wqkv_ref,     # (E, 3E)     folded q|k|v weights (q pre-scaled)
                        wo_ref,       # (E, E)      output projection weights
                        ball_ref,     # (1, 4E)     packed biases [bq|bk|bv|bo], f32
                        o_ref,        # (Bt, N, E)  output, f32
                        *, num_heads, mxu_dtype, approx_recip):
    Bt, N, E = x_ref.shape
    H = num_heads
    Dh = E // H
    S = Bt * N

    # (Bt, N, E) -> (S, E): leading-dim merge only (layout-trivial).
    x2d = x_ref[...].reshape(S, E)

    # Single fused qkv projection (chained linears + softmax scale folded on the host).
    qkv = jnp.dot(x2d, wqkv_ref[...], preferred_element_type=jnp.float32) \
        + ball_ref[:, :3 * E]                                              # (S, 3E) f32

    def split_heads(off):
        # (S, E) lane block at `off` -> (H, S, Dh): O(H) static lane slices,
        # independent of the batch tile (no per-batch unrolling).
        return jnp.stack(
            [qkv[:, off + h * Dh: off + (h + 1) * Dh] for h in range(H)], axis=0
        ).astype(mxu_dtype)

    qh = split_heads(0)          # (H, S, Dh)   (softmax scale already folded into q)
    kh = split_heads(E)
    vh = split_heads(2 * E)

    # Joint per-head scores over the whole batch tile: (H, S, S).
    s = jnp.einsum("hnd,hmd->hnm", qh, kh, preferred_element_type=jnp.float32)
    # One additive bias covers key-padding AND cross-batch separation (precomputed in the
    # wrapper); exp(-1e30 - m) underflows to exactly 0, so valid rows match the reference.
    s = s + bias_ref[0]

    # Numerically stable softmax, kept entirely in f32 (v5e VPU/EUP have no bf16).
    m = jnp.max(s, axis=-1, keepdims=True)
    ex = jnp.exp(s - m)
    p = ex * pl.reciprocal(jnp.sum(ex, axis=-1, keepdims=True), approx=approx_recip)

    o = jnp.einsum("hnm,hmd->hnd", p.astype(mxu_dtype), vh,
                   preferred_element_type=jnp.float32)                     # (H, S, Dh)

    # Merge heads back to (S, E): O(H) static lane concat.
    o2d = jnp.concatenate([o[h] for h in range(H)], axis=-1).astype(mxu_dtype)

    z = jnp.dot(o2d, wo_ref[...], preferred_element_type=jnp.float32) \
        + ball_ref[:, 3 * E:]                                              # (S, E) f32

    o_ref[...] = z.reshape(Bt, N, E)     # leading-dim split only (layout-trivial)


# ------------------------------- wrapper -------------------------------------
def _pick_batch_tile(B, N, max_joint_rows=256):
    """Batch-tile selection.

    Per-grid-step overhead (~0.35us / ~600 cycles) dominates this kernel's tiny per-step
    compute, so we keep a SINGLE grid step whenever the fused per-step attention
    (a (Bt*N, Bt*N) score block per head) stays within ~one MXU tile.  For large batches
    we pick the largest divisor of B under that cap; splitting the grid only pays on v7x
    (2 TensorCores) once each step carries several us of work — on v5e/v6e extra grid
    steps are pure overhead.
    """
    if B * N <= max_joint_rows:
        return B
    cap = max(1, max_joint_rows // max(N, 1))
    for bt in range(min(B, cap), 0, -1):
        if B % bt == 0:
            return bt
    return 1


def hh_attention(x, detected_humans, params, num_heads, *, batch_tile=None,
                 use_bf16=False, approx_softmax_recip=None):
    """x: (B, N, E) f32, detected_humans: (B,) int, params: dict of torch-layout weights."""
    B, N, E = x.shape
    assert E % num_heads == 0
    Dh = E // num_heads
    scale = float(Dh) ** -0.5
    f32 = jnp.float32
    mxu_dtype = jnp.bfloat16 if use_bf16 else jnp.float32
    if approx_softmax_recip is None:
        approx_softmax_recip = use_bf16    # exact recip on the f32 (1e-5 parity) path

    wq1, bq1 = params["wq1"], params["bq1"]
    wk1, bk1 = params["wk1"], params["bk1"]
    wv1, bv1 = params["wv1"], params["bv1"]
    in_w, in_b = params["in_proj_w"], params["in_proj_b"]     # (3E, E), (3E,)
    wo, bo = params["out_w"], params["out_b"]
    wq2, wk2, wv2 = in_w[:E], in_w[E:2 * E], in_w[2 * E:]
    bq2, bk2, bv2 = in_b[:E], in_b[E:2 * E], in_b[2 * E:]

    def fold(w1, b1, w2, b2, s=1.0):
        # torch: y = ((x @ w1.T + b1) @ w2.T + b2) == x @ (w1.T @ w2.T) + (b1 @ w2.T + b2)
        w = (w1.T.astype(f32) @ w2.T.astype(f32)) * s
        b = (b1.astype(f32) @ w2.T.astype(f32) + b2.astype(f32)) * s
        return w, b

    wq, bq = fold(wq1, bq1, wq2, bq2, s=scale)   # softmax scale folded into q
    wk, bk = fold(wk1, bk1, wk2, bk2)
    wv, bv = fold(wv1, bv1, wv2, bv2)

    # Lane-dense weight slabs, pre-cast to the MXU dtype on the host (halves weight DMA and
    # removes per-step VPU casts); all four biases packed into ONE (1, 4E) f32 row.
    w_qkv = jnp.concatenate([wq, wk, wv], axis=1).astype(mxu_dtype)              # (E, 3E)
    w_o = wo.T.astype(f32).astype(mxu_dtype)                                     # (E, E)
    b_all = jnp.concatenate([bq, bk, bv, bo.astype(f32)], axis=0).reshape(1, 4 * E)

    if batch_tile is None:
        batch_tile = _pick_batch_tile(B, N)
    assert B % batch_tile == 0, "batch_tile must divide batch size"
    G = B // batch_tile
    S = batch_tile * N

    # Additive attention bias, built once in the wrapper (fully vectorized): key column c is
    # visible to query row r of the same grid step iff they belong to the same batch AND the
    # key index is < detected_humans[batch].  Finite -1e30 keeps a zero-detected-humans row
    # finite (uniform) instead of torch's NaN.
    det = detected_humans.astype(jnp.int32).reshape(G, batch_tile)               # (G, Bt)
    key_ok = (jnp.arange(N)[None, None, :] < det[:, :, None]).reshape(G, S)      # (G, S)
    joint_b = jnp.arange(S) // N
    same_batch = joint_b[:, None] == joint_b[None, :]                            # (S, S)
    attn_bias = jnp.where(same_batch[None] & key_ok[:, None, :],
                          f32(0.0), f32(-1e30))                                  # (G, S, S)

    grid_spec = pltpu.PrefetchScalarGridSpec(
        num_scalar_prefetch=0,
        grid=(G,),
        in_specs=[
            pl.BlockSpec((batch_tile, N, E), lambda i: (i, 0, 0)),
            pl.BlockSpec((1, S, S), lambda i: (i, 0, 0)),
            pl.BlockSpec((E, 3 * E), lambda i: (0, 0)),
            pl.BlockSpec((E, E), lambda i: (0, 0)),
            pl.BlockSpec((1, 4 * E), lambda i: (0, 0)),
        ],
        out_specs=pl.BlockSpec((batch_tile, N, E), lambda i: (i, 0, 0)),
    )

    kernel = functools.partial(
        hh_attention_kernel,
        num_heads=num_heads,
        mxu_dtype=mxu_dtype,
        approx_recip=approx_softmax_recip,
    )

    return pl.pallas_call(
        kernel,
        out_shape=jax.ShapeDtypeStruct((B, N, E), jnp.float32),
        grid_spec=grid_spec,
        # Per-step VMEM footprint here is << 1 MiB, so no vmem_limit override is needed even
        # on v7x (64 MiB).  The single grid axis is "parallel" so large batches shard over
        # v7x's two TensorCores; for the test shapes the grid collapses to a single step.
        compiler_params=pltpu.CompilerParams(dimension_semantics=("parallel",)),
    )(x.astype(mxu_dtype), attn_bias, w_qkv, w_o, b_all)


# --------------------------- pure-JAX reference -------------------------------
def hh_attention_ref(x, detected_humans, params, num_heads):
    B, N, E = x.shape
    Dh = E // num_heads
    wq1, bq1 = params["wq1"], params["bq1"]
    wk1, bk1 = params["wk1"], params["bk1"]
    wv1, bv1 = params["wv1"], params["bv1"]
    in_w, in_b = params["in_proj_w"], params["in_proj_b"]
    wo, bo = params["out_w"], params["out_b"]
    wq2, wk2, wv2 = in_w[:E], in_w[E:2 * E], in_w[2 * E:]
    bq2, bk2, bv2 = in_b[:E], in_b[E:2 * E], in_b[2 * E:]

    q = x @ wq1.T + bq1; k = x @ wk1.T + bk1; v = x @ wv1.T + bv1
    q = q @ wq2.T + bq2; k = k @ wk2.T + bk2; v = v @ wv2.T + bv2

    def split(t):  # (B, N, E) -> (B, H, N, Dh)
        return t.reshape(B, N, num_heads, Dh).transpose(0, 2, 1, 3)
    qh, kh, vh = split(q), split(k), split(v)
    s = jnp.einsum("bhnd,bhmd->bhnm", qh, kh) * (float(Dh) ** -0.5)
    key_pad = jnp.arange(N)[None, :] >= detected_humans[:, None]        # (B, N) True = padding
    s = jnp.where(key_pad[:, None, None, :], -jnp.inf, s)
    p = jax.nn.softmax(s, axis=-1)
    o = jnp.einsum("bhnm,bhmd->bhnd", p, vh).transpose(0, 2, 1, 3).reshape(B, N, E)
    return o @ wo.T + bo


# ----------------------------- parameter init ---------------------------------
def make_params(key, E):
    """Synthetic init mirroring the module's __init__ shapes (biases randomized so the
    bias-folding path in the wrapper is actually exercised)."""
    keys = jax.random.split(key, 10)

    def orthogonal(k, gain):
        a = np.asarray(jax.random.normal(k, (E, E), dtype=jnp.float32))
        q, r = np.linalg.qr(a)
        q = q * np.sign(np.diag(r))
        return jnp.asarray(gain * q, dtype=jnp.float32)

    gain = float(np.sqrt(2.0))
    params = {
        "wq1": orthogonal(keys[0], gain),
        "wk1": orthogonal(keys[1], gain),
        "wv1": orthogonal(keys[2], gain),
        "bq1": 0.1 * jax.random.normal(keys[3], (E,), jnp.float32),
        "bk1": 0.1 * jax.random.normal(keys[4], (E,), jnp.float32),
        "bv1": 0.1 * jax.random.normal(keys[5], (E,), jnp.float32),
    }
    xav = float(np.sqrt(6.0 / (E + 3 * E)))
    params["in_proj_w"] = jax.random.uniform(keys[6], (3 * E, E), jnp.float32, -xav, xav)
    params["in_proj_b"] = 0.1 * jax.random.normal(keys[7], (3 * E,), jnp.float32)
    bound = 1.0 / float(np.sqrt(E))
    params["out_w"] = jax.random.uniform(keys[8], (E, E), jnp.float32, -bound, bound)
    params["out_b"] = 0.1 * jax.random.normal(keys[9], (E,), jnp.float32)
    return params


if __name__ == "__main__":
    B, N, E, H = 2, 8, 32, 4      # batch, max_human_num, HHAttn_attn_size, HHAttn_num_heads

    key = jax.random.PRNGKey(0)
    k_x, k_p = jax.random.split(key)
    x = jax.random.normal(k_x, (B, N, E), dtype=jnp.float32)          # input edge features
    detected_humans = jnp.array([3, 8], dtype=jnp.int32)              # per-batch #detected humans
    params = make_params(k_p, E)

    z_ref = jax.block_until_ready(hh_attention_ref(x, detected_humans, params, num_heads=H))

    # f32 MXU path: parity with the pure-JAX reference at 1e-5.
    z = jax.block_until_ready(hh_attention(x, detected_humans, params, num_heads=H))
    np.testing.assert_allclose(np.asarray(z), np.asarray(z_ref), rtol=1e-5, atol=1e-5)

    # bf16 MXU path (native on v5e/v6e/v7x): weights/activations pre-cast on the host,
    # f32 accumulation, EUP approx reciprocal -> looser tolerance.
    z_bf16 = jax.block_until_ready(
        hh_attention(x, detected_humans, params, num_heads=H, use_bf16=True))
    np.testing.assert_allclose(np.asarray(z_bf16), np.asarray(z_ref), rtol=1e-1, atol=1e-1)

    print("KERNEL_OK")
</pallas_src>

<mosaic_0001>
module attributes {stable_mosaic.version = 11 : i64} {
  func.func @hh_attention_kernel(%arg0: i32, %arg1: memref<2x8x32xf32, #tpu.memory_space<vmem>>, %arg2: memref<1x16x16xf32, #tpu.memory_space<vmem>>, %arg3: memref<32x96xf32, #tpu.memory_space<vmem>>, %arg4: memref<32x32xf32, #tpu.memory_space<vmem>>, %arg5: memref<1x128xf32, #tpu.memory_space<vmem>>, %arg6: memref<2x8x32xf32, #tpu.memory_space<vmem>>) attributes {dimension_semantics = [#tpu.dimension_semantics<parallel>], iteration_bounds = array<i64: 1>, scalar_prefetch = 0 : i64, scratch_operands = 0 : i64, tpu.core_type = #tpu.core_type<tc>, window_params = [{transform_indices = @transform_0, window_bounds = array<i64: 2, 8, 32>}, {transform_indices = @transform_1, window_bounds = array<i64: 1, 16, 16>}, {pipeline_mode = #tpu.pipeline_mode<synchronous>, transform_indices = @transform_2, window_bounds = array<i64: 32, 96>}, {pipeline_mode = #tpu.pipeline_mode<synchronous>, transform_indices = @transform_3, window_bounds = array<i64: 32, 32>}, {pipeline_mode = #tpu.pipeline_mode<synchronous>, transform_indices = @transform_4, window_bounds = array<i64: 1, 128>}, {transform_indices = @transform_5, window_bounds = array<i64: 2, 8, 32>}]} {
    %c0 = arith.constant 0 : index
    %c0_0 = arith.constant 0 : index
    %c0_1 = arith.constant 0 : index
    %0 = vector.load %arg1[%c0, %c0_0, %c0_1] : memref<2x8x32xf32, #tpu.memory_space<vmem>>, vector<2x8x32xf32>
    %1 = vector.shape_cast %0 : vector<2x8x32xf32> to vector<16x32xf32>
    %c0_2 = arith.constant 0 : index
    %c0_3 = arith.constant 0 : index
    %2 = vector.load %arg3[%c0_2, %c0_3] : memref<32x96xf32, #tpu.memory_space<vmem>>, vector<32x96xf32>
    %cst = arith.constant dense<0.000000e+00> : vector<16x96xf32>
    %3 = tpu.matmul %1, %2, %cst {dimension_numbers = #tpu.dot_dimension_numbers<[1], [0], [0], [1], [0, 0, 1, 1], [], []>} : vector<16x32xf32>, vector<32x96xf32>, vector<16x96xf32> -> vector<16x96xf32>
    %c0_4 = arith.constant 0 : index
    %c0_5 = arith.constant 0 : index
    %4 = vector.load %arg5[%c0_4, %c0_5] : memref<1x128xf32, #tpu.memory_space<vmem>>, vector<1x96xf32>
    %5 = vector.broadcast %4 : vector<1x96xf32> to vector<16x96xf32>
    %6 = arith.addf %3, %5 : vector<16x96xf32>
    %7 = vector.extract_strided_slice %6 {offsets = [0, 0], sizes = [16, 8], strides = [1, 1]} : vector<16x96xf32> to vector<16x8xf32>
    %8 = vector.extract_strided_slice %6 {offsets = [0, 8], sizes = [16, 8], strides = [1, 1]} : vector<16x96xf32> to vector<16x8xf32>
    %9 = vector.extract_strided_slice %6 {offsets = [0, 16], sizes = [16, 8], strides = [1, 1]} : vector<16x96xf32> to vector<16x8xf32>
    %10 = vector.extract_strided_slice %6 {offsets = [0, 24], sizes = [16, 8], strides = [1, 1]} : vector<16x96xf32> to vector<16x8xf32>
    %11 = vector.shape_cast %7 : vector<16x8xf32> to vector<1x16x8xf32>
    %12 = vector.shape_cast %8 : vector<16x8xf32> to vector<1x16x8xf32>
    %13 = vector.shape_cast %9 : vector<16x8xf32> to vector<1x16x8xf32>
    %14 = vector.shape_cast %10 : vector<16x8xf32> to vector<1x16x8xf32>
    %15 = tpu.concatenate %11, %12, %13, %14 in 0 : vector<1x16x8xf32>, vector<1x16x8xf32>, vector<1x16x8xf32>, vector<1x16x8xf32> -> vector<4x16x8xf32>
    %16 = vector.extract_strided_slice %6 {offsets = [0, 32], sizes = [16, 8], strides = [1, 1]} : vector<16x96xf32> to vector<16x8xf32>
    %17 = vector.extract_strided_slice %6 {offsets = [0, 40], sizes = [16, 8], strides = [1, 1]} : vector<16x96xf32> to vector<16x8xf32>
    %18 = vector.extract_strided_slice %6 {offsets = [0, 48], sizes = [16, 8], strides = [1, 1]} : vector<16x96xf32> to vector<16x8xf32>
    %19 = vector.extract_strided_slice %6 {offsets = [0, 56], sizes = [16, 8], strides = [1, 1]} : vector<16x96xf32> to vector<16x8xf32>
    %20 = vector.shape_cast %16 : vector<16x8xf32> to vector<1x16x8xf32>
    %21 = vector.shape_cast %17 : vector<16x8xf32> to vector<1x16x8xf32>
    %22 = vector.shape_cast %18 : vector<16x8xf32> to vector<1x16x8xf32>
    %23 = vector.shape_cast %19 : vector<16x8xf32> to vector<1x16x8xf32>
    %24 = tpu.concatenate %20, %21, %22, %23 in 0 : vector<1x16x8xf32>, vector<1x16x8xf32>, vector<1x16x8xf32>, vector<1x16x8xf32> -> vector<4x16x8xf32>
    %25 = vector.extract_strided_slice %6 {offsets = [0, 64], sizes = [16, 8], strides = [1, 1]} : vector<16x96xf32> to vector<16x8xf32>
    %26 = vector.extract_strided_slice %6 {offsets = [0, 72], sizes = [16, 8], strides = [1, 1]} : vector<16x96xf32> to vector<16x8xf32>
    %27 = vector.extract_strided_slice %6 {offsets = [0, 80], sizes = [16, 8], strides = [1, 1]} : vector<16x96xf32> to vector<16x8xf32>
    %28 = vector.extract_strided_slice %6 {offsets = [0, 88], sizes = [16, 8], strides = [1, 1]} : vector<16x96xf32> to vector<16x8xf32>
    %29 = vector.shape_cast %25 : vector<16x8xf32> to vector<1x16x8xf32>
    %30 = vector.shape_cast %26 : vector<16x8xf32> to vector<1x16x8xf32>
    %31 = vector.shape_cast %27 : vector<16x8xf32> to vector<1x16x8xf32>
    %32 = vector.shape_cast %28 : vector<16x8xf32> to vector<1x16x8xf32>
    %33 = tpu.concatenate %29, %30, %31, %32 in 0 : vector<1x16x8xf32>, vector<1x16x8xf32>, vector<1x16x8xf32>, vector<1x16x8xf32> -> vector<4x16x8xf32>
    "tpu.trace_start"() <{level = 10 : i32, message = "hnd,hmd->hnm"}> : () -> ()
    %cst_6 = arith.constant dense<0.000000e+00> : vector<4x16x16xf32>
    %34 = tpu.matmul %15, %24, %cst_6 {dimension_numbers = #tpu.dot_dimension_numbers<[2], [2], [1], [1], [0, 0, 0, 1, 1, 1], [0], [0]>} : vector<4x16x8xf32>, vector<4x16x8xf32>, vector<4x16x16xf32> -> vector<4x16x16xf32>
    "tpu.trace_stop"() : () -> ()
    %c0_7 = arith.constant 0 : index
    %c0_8 = arith.constant 0 : index
    %c0_9 = arith.constant 0 : index
    %35 = vector.load %arg2[%c0_7, %c0_8, %c0_9] : memref<1x16x16xf32, #tpu.memory_space<vmem>>, vector<1x16x16xf32>
    %36 = vector.shape_cast %35 : vector<1x16x16xf32> to vector<16x16xf32>
    %37 = vector.shape_cast %36 : vector<16x16xf32> to vector<1x16x16xf32>
    %38 = vector.broadcast %37 : vector<1x16x16xf32> to vector<4x16x16xf32>
    %39 = arith.addf %34, %38 : vector<4x16x16xf32>
    %cst_10 = arith.constant dense<0xFF800000> : vector<4x16xf32>
    %40 = vector.multi_reduction <maximumf>, %39, %cst_10 [2] : vector<4x16x16xf32> to vector<4x16xf32>
    %41 = vector.shape_cast %40 : vector<4x16xf32> to vector<4x16x1xf32>
    %42 = vector.broadcast %41 : vector<4x16x1xf32> to vector<4x16x16xf32>
    %43 = arith.subf %39, %42 : vector<4x16x16xf32>
    %44 = math.exp %43 : vector<4x16x16xf32>
    %cst_11 = arith.constant dense<0.000000e+00> : vector<4x16xf32>
    %45 = vector.multi_reduction <add>, %44, %cst_11 [2] : vector<4x16x16xf32> to vector<4x16xf32>
    %46 = vector.shape_cast %45 : vector<4x16xf32> to vector<4x16x1xf32>
    %47 = tpu.reciprocal %46 : vector<4x16x1xf32> -> vector<4x16x1xf32>
    %48 = vector.broadcast %47 : vector<4x16x1xf32> to vector<4x16x16xf32>
    %49 = arith.mulf %44, %48 : vector<4x16x16xf32>
    "tpu.trace_start"() <{level = 10 : i32, message = "hnm,hmd->hnd"}> : () -> ()
    %cst_12 = arith.constant dense<0.000000e+00> : vector<4x16x8xf32>
    %50 = tpu.matmul %49, %33, %cst_12 {dimension_numbers = #tpu.dot_dimension_numbers<[2], [1], [1], [2], [0, 0, 0, 1, 1, 2], [0], [0]>} : vector<4x16x16xf32>, vector<4x16x8xf32>, vector<4x16x8xf32> -> vector<4x16x8xf32>
    "tpu.trace_stop"() : () -> ()
    %51 = vector.extract_strided_slice %50 {offsets = [0, 0, 0], sizes = [1, 16, 8], strides = [1, 1, 1]} : vector<4x16x8xf32> to vector<1x16x8xf32>
    %52 = vector.shape_cast %51 : vector<1x16x8xf32> to vector<16x8xf32>
    %53 = vector.extract_strided_slice %50 {offsets = [1, 0, 0], sizes = [1, 16, 8], strides = [1, 1, 1]} : vector<4x16x8xf32> to vector<1x16x8xf32>
    %54 = vector.shape_cast %53 : vector<1x16x8xf32> to vector<16x8xf32>
    %55 = vector.extract_strided_slice %50 {offsets = [2, 0, 0], sizes = [1, 16, 8], strides = [1, 1, 1]} : vector<4x16x8xf32> to vector<1x16x8xf32>
    %56 = vector.shape_cast %55 : vector<1x16x8xf32> to vector<16x8xf32>
    %57 = vector.extract_strided_slice %50 {offsets = [3, 0, 0], sizes = [1, 16, 8], strides = [1, 1, 1]} : vector<4x16x8xf32> to vector<1x16x8xf32>
    %58 = vector.shape_cast %57 : vector<1x16x8xf32> to vector<16x8xf32>
    %59 = tpu.concatenate %52, %54, %56, %58 in 1 : vector<16x8xf32>, vector<16x8xf32>, vector<16x8xf32>, vector<16x8xf32> -> vector<16x32xf32>
    %c0_13 = arith.constant 0 : index
    %c0_14 = arith.constant 0 : index
    %60 = vector.load %arg4[%c0_13, %c0_14] : memref<32x32xf32, #tpu.memory_space<vmem>>, vector<32x32xf32>
    %cst_15 = arith.constant dense<0.000000e+00> : vector<16x32xf32>
    %61 = tpu.matmul %59, %60, %cst_15 {dimension_numbers = #tpu.dot_dimension_numbers<[1], [0], [0], [1], [0, 0, 1, 1], [], []>} : vector<16x32xf32>, vector<32x32xf32>, vector<16x32xf32> -> vector<16x32xf32>
    %c0_16 = arith.constant 0 : index
    %c96 = arith.constant 96 : index
    %62 = vector.load %arg5[%c0_16, %c96] : memref<1x128xf32, #tpu.memory_space<vmem>>, vector<1x32xf32>
    %63 = vector.broadcast %62 : vector<1x32xf32> to vector<16x32xf32>
    %64 = arith.addf %61, %63 : vector<16x32xf32>
    %65 = vector.shape_cast %64 : vector<16x32xf32> to vector<2x8x32xf32>
    %c0_17 = arith.constant 0 : index
    %c0_18 = arith.constant 0 : index
    %c0_19 = arith.constant 0 : index
    %66 = vector.load %arg6[%c0_17, %c0_18, %c0_19] : memref<2x8x32xf32, #tpu.memory_space<vmem>>, vector<2x8x32xf32>
    tpu.vector_store %arg6[%c0_17, %c0_18, %c0_19], %65 {strides = array<i32>} : memref<2x8x32xf32, #tpu.memory_space<vmem>>, vector<2x8x32xf32>,
    return
  }
  func.func @transform_0(%arg0: i32) -> (i32, i32, i32) {
    %c0_i32 = arith.constant 0 : i32
    %c0_i32_0 = arith.constant 0 : i32
    %c0_i32_1 = arith.constant 0 : i32
    return %arg0, %c0_i32, %c0_i32_0 : i32, i32, i32
  }
  func.func @transform_1(%arg0: i32) -> (i32, i32, i32) {
    %c0_i32 = arith.constant 0 : i32
    %c0_i32_0 = arith.constant 0 : i32
    %c0_i32_1 = arith.constant 0 : i32
    return %arg0, %c0_i32, %c0_i32_0 : i32, i32, i32
  }
  func.func @transform_2(%arg0: i32) -> (i32, i32) {
    %c0_i32 = arith.constant 0 : i32
    %c0_i32_0 = arith.constant 0 : i32
    %c0_i32_1 = arith.constant 0 : i32
    return %c0_i32, %c0_i32_0 : i32, i32
  }
  func.func @transform_3(%arg0: i32) -> (i32, i32) {
    %c0_i32 = arith.constant 0 : i32
    %c0_i32_0 = arith.constant 0 : i32
    %c0_i32_1 = arith.constant 0 : i32
    return %c0_i32, %c0_i32_0 : i32, i32
  }
  func.func @transform_4(%arg0: i32) -> (i32, i32) {
    %c0_i32 = arith.constant 0 : i32
    %c0_i32_0 = arith.constant 0 : i32
    %c0_i32_1 = arith.constant 0 : i32
    return %c0_i32, %c0_i32_0 : i32, i32
  }
  func.func @transform_5(%arg0: i32) -> (i32, i32, i32) {
    %c0_i32 = arith.constant 0 : i32
    %c0_i32_0 = arith.constant 0 : i32
    %c0_i32_1 = arith.constant 0 : i32
    return %arg0, %c0_i32, %c0_i32_0 : i32, i32, i32
  }
}

</mosaic_0001>

<bundles_post_ra>
// kernel: tpu_custom_call.1
= control target key start
LH: loop header
LB: loop body
LE: loop exit
PB: predicated region body
PF: predicated region fallthrough
CT: control target
= control target key end

     0   :  { %10 = vsyncpa [#allocation3], 0  ;;  %s1245_s0 = inlined_call_operand.hbm [shape: f32[2,8,32], index: 0, kind: input, shape index: {}]   ;;  %s1246_s1 = inlined_call_operand.hbm [shape: f32[1,16,16], index: 1, kind: input, shape index: {}]   ;;  %s1247_s2 = inlined_call_operand.hbm [shape: f32[32,96], index: 2, kind: input, shape index: {}]   ;;  %s1248_s3 = inlined_call_operand.hbm [shape: f32[32,32], index: 3, kind: input, shape index: {}]   ;;  %s1249_s4 = inlined_call_operand.vmem [shape: f32[1,128], index: 4, kind: input, shape index: {}]   ;;  %s1250_s5 = inlined_call_operand.hbm [shape: f32[2,8,32], index: 5, kind: output, shape index: {}]  }
   0x1   :  { %11 = vsyncpa [#allocation6], 0 }
   0x2   :  { %12 = vsyncpa [#allocation9], 0 }
   0x3   :  { %13 = vsyncpa [#allocation4], 0  ;;  %s31_s20 = sshll.u32 %s1246_s1, 4  ;;  %s938_s21 = smov [#allocation5]   ;;  %s32_s20 = int_to_ptr.hbm [resolvable:$true] %s31_s20 }
   0x4   :  { %s33_s22 = sshll.u32 %s938_s21, 4  ;;  %s18_s25 = sshll.u32 %s1245_s0, 4  ;;  %s34_s22 = int_to_ptr.vmem [resolvable:$true] %s33_s22  ;;  %s19_s25 = int_to_ptr.hbm [resolvable:$true] %s18_s25 }
   0x5   :  { %s939_s26 = smov 128   ;;  %s940_s27 = smov 8  }
   0x6   :  { %39 = dma.hbm_to_vmem [thread:$0]  %s32_s20, 256, %s34_s22, [#allocation6], %s939_s26, %s939_s26, %s940_s27  }
   0x7   :  { %s941_s28 = smov [#allocation2]   ;;  %s44_s1 = sshll.u32 %s1247_s2, 4  ;;  %s45_s1 = int_to_ptr.hbm [resolvable:$true] %s44_s1 }
   0x8   :  { %s20_s29 = sshll.u32 %s941_s28, 4  ;;  %s57_s8 = sshll.u32 %s1248_s3, 4  ;;  %s21_s29 = int_to_ptr.vmem [resolvable:$true] %s20_s29  ;;  %s58_s8 = int_to_ptr.hbm [resolvable:$true] %s57_s8 }
   0x9   :  { %26 = dma.hbm_to_vmem [thread:$0]  %s19_s25, 256, %s21_s29, [#allocation3], %s939_s26, %s939_s26, %s940_s27  }
   0xa   :  { %s942_s9 = smov [#allocation7]   ;;  %s943_s11 = smov [#allocation8]  }
   0xb   :  { %s46_s10 = sshll.u32 %s942_s9, 4  ;;  %s59_s2 = sshll.u32 %s943_s11, 4  ;;  %s47_s10 = int_to_ptr.vmem [resolvable:$true] %s46_s10  ;;  %s60_s2 = int_to_ptr.vmem [resolvable:$true] %s59_s2 }
   0xc   :  { %52 = dma.hbm_to_vmem [thread:$0]  %s45_s1, 512, %s47_s10, [#allocation6], %s939_s26, %s939_s26, %s940_s27  }
   0xd   :  { %65 = dma.hbm_to_vmem [thread:$0]  %s58_s8, 512, %s60_s2, [#allocation9], %s939_s26, %s939_s26, %s940_s27  }
   0xe   :  { %930 = dma.done.wait [#allocation3], 256  }
   0xf   :  { %931 = vsyncadd [#allocation3], 4294967040 }
  0x10   :  { %932 = dma.done.wait [#allocation6], 768  }
  0x11   :  { %933 = vsyncadd [#allocation6], 4294966528 }
  0x12   :  { %934 = dma.done.wait [#allocation9], 512  }
  0x13   :  { %935 = vsyncadd [#allocation9], 4294966784  ;;  %v89_v0 = vld [vmem:[#allocation7 + $0x18] sm:$0xff]  ;;  %v88_v1 = vld [vmem:[#allocation7 + $0x10] sm:$0xff]  ;;  %vm94_vm0 = vcmask 261120   ;;  %s944_s13 = smov 120  }
  0x14   :  { %113 = vmatpush.msra.mxu0 %v89_v0  ;;  %735 = vmatpush.msra.mxu2 %v89_v0  ;;  %v87_v2 = vld [vmem:[#allocation7 + $0x8] sm:$0xff]  ;;  %v86_v3 = vld [vmem:[#allocation7] sm:$0xff]  ;;  %s945_s14 = smov 104   ;;  %s946_s15 = smov 112   ;;  %vm144_vm1 = vcmask 64512   ;;  %v138_v25 = vld [vmem:[#allocation5] sm:$0xff] }
  0x15   :  { %v84_v4 = vld [vmem:[#allocation2] sm:$0xff]  ;;  %v85_v5 = vld [vmem:[#allocation2 + $0x8] sm:$0xff]  ;;  %s947_s16 = smov 96   ;;  %vm281_vm2 = vcmask 130048   ;;  %v139_v29 = vld [vmem:[#allocation5 + $0x8] sm:$0xff]  ;;  %s948_s17 = smov 64  }
  0x16   :  { %114 = vmatpush.msra.mxu0 %v88_v1  ;;  %736 = vmatpush.msra.mxu2 %v88_v1  ;;  %v776_v6 = vld [vmem:[%s1249_s4] ss:$0 sm:$0xff]  ;;  %s949_s18 = smov 24   ;;  %s950_s19 = smov 16  }
  0x17   :  { %s951_s22 = smov 32   ;;  %s692_s28 = sshll.u32 %s1250_s5, 4  ;;  %s693_s28 = int_to_ptr.hbm [resolvable:$true] %s692_s28 }
  0x18   :  { %115 = vmatpush.msra.mxu0 %v87_v2  ;;  %737 = vmatpush.msra.mxu2 %v87_v2 }
  0x1a   :  { %116 = vmatpush.msra.mxu0 %v86_v3  ;;  %738 = vmatpush.msra.mxu2 %v86_v3 }
  0x1b   :  { %707 = vmatmul.msk.f32.vlgmr.msra.gmra.mxu0 %vm94_vm0, %v84_v4  ;;  %708 = vmatmul.msk.f32.vlgmr.msra.gmra.mxu2 %vm94_vm0, %v85_v5 }
  0x98   :  { %v118_v7 = vpop.f32.mrf.mxu0 }
  0x99   :  { %v1012_v8 = vadd.f32 %v776_v6, %v118_v7 }
  0x9b   :  { %126 = vrot.lane.b32.xlu1 %v1012_v8, %s944_s13 }
  0x9e   :  { %v121_v9 = vpop.f32.mrf.mxu2 }
  0x9f   :  { %v1015_v10 = vadd.f32 %v776_v6, %v121_v9 }
  0xa1   :  { %136 = vrot.lane.b32.xlu2 %v1015_v10, %s945_s14  ;;  %128 = vrot.lane.b32.xlu0 %v1015_v10, %s944_s13 }
  0xa3   :  { %130 = vrot.lane.b32.xlu1 %v1012_v8, %s946_s15 }
  0xa9   :  { %132 = vrot.lane.b32.xlu0 %v1015_v10, %s946_s15  ;;  %134 = vrot.lane.b32.xlu2 %v1012_v8, %s945_s14 }
  0xab   :  { %140 = vrot.lane.b32.xlu1 %v1012_v8, %s947_s16 }
  0xb1   :  { %142 = vrot.lane.b32.xlu0 %v1015_v10, %s947_s16 }
  0xfb   :  { %v1024_v11 = vpop.permute.xlu2 %136 }
 0x103   :  { %v1032_v14 = vpop.permute.xlu2 %134 }
 0x10d   :  { %v1026_v12 = vpop.permute.xlu1 %126 }
 0x10e   :  { %176 = vrot.lane.b32.xlu1 %v1026_v12, %s947_s16 }
 0x113   :  { %v1029_v13 = vpop.permute.xlu0 %128 }
 0x114   :  { %178 = vrot.lane.b32.xlu2 %v1029_v13, %s947_s16 }
 0x115   :  { %v1035_v15 = vpop.permute.xlu1 %130 }
 0x116   :  { %246 = vrot.lane.b32.xlu1 %v1032_v14, %s947_s16 }
 0x11b   :  { %v1037_v16 = vpop.permute.xlu0 %132 }
 0x11c   :  { %213 = vrot.lane.b32.xlu0 %v1037_v16, %s947_s16  ;;  %211 = vrot.lane.b32.xlu2 %v1035_v15, %s947_s16 }
 0x11d   :  { %v141_v18 = vpop.permute.xlu1 %140 }
 0x123   :  { %v143_v17 = vpop.permute.xlu0 %142 }
 0x124   :  { %248 = vrot.lane.b32.xlu0 %v1024_v11, %s947_s16  ;;  %709 = vmatpush.xpose.msk.msra.mxu1 %vm144_vm1, %v143_v17 }
 0x125   :  { %739 = vmatpush.xpose.msk.msra.mxu3 %vm144_vm1, %v143_v17 }
 0x128   :  { %710 = vmatpush.xpose.msk.msra.mxu1 %vm144_vm1, %v141_v18 }
 0x129   :  { %740 = vmatpush.xpose.msk.msra.mxu3 %vm144_vm1, %v141_v18 }
 0x12b   :  { %711 = vmatmul.msk.f32.vlgmr.msra.gmra.mxu1 %vm144_vm1, %v1012_v8 }
 0x12c   :  { %712 = vmatmul.msk.f32.vlgmr.msra.gmra.mxu3 %vm144_vm1, %v1015_v10 }
 0x16e   :  { %v179_v19 = vpop.permute.xlu2 %178 }
 0x16f   :  { %713 = vmatpush.xpose.msk.msrb.mxu2 %vm144_vm1, %v179_v19 }
 0x176   :  { %v212_v22 = vpop.permute.xlu2 %211 }
 0x180   :  { %v177_v20 = vpop.permute.xlu1 %176 }
 0x181   :  { %714 = vmatpush.xpose.msk.msrb.mxu2 %vm144_vm1, %v177_v20 }
 0x184   :  { %715 = vmatmul.msk.f32.vlgmr.msrb.gmra.mxu2 %vm144_vm1, %v1026_v12 }
 0x188   :  { %v247_v24 = vpop.permute.xlu1 %246 }
 0x18c   :  { %716 = vmatmul.msk.f32.gmra.mxu2 %vm144_vm1, %v1029_v13 }
 0x18e   :  { %v214_v21 = vpop.permute.xlu0 %213 }
 0x18f   :  { %717 = vmatpush.xpose.msk.msrb.mxu3 %vm144_vm1, %v214_v21 }
 0x193   :  { %718 = vmatpush.xpose.msk.msrb.mxu3 %vm144_vm1, %v212_v22 }
 0x196   :  { %v249_v23 = vpop.permute.xlu0 %248  ;;  %719 = vmatmul.msk.f32.vlgmr.msrb.gmra.mxu3 %vm144_vm1, %v1035_v15 }
 0x197   :  { %721 = vmatpush.xpose.msk.msrb.mxu0 %vm144_vm1, %v249_v23 }
 0x19b   :  { %722 = vmatpush.xpose.msk.msrb.mxu0 %vm144_vm1, %v247_v24 }
 0x19e   :  { %720 = vmatmul.msk.f32.gmra.mxu3 %vm144_vm1, %v1037_v16  ;;  %723 = vmatmul.msk.f32.vlgmr.msrb.gmra.mxu0 %vm144_vm1, %v1032_v14 }
 0x1a6   :  { %724 = vmatmul.msk.f32.gmra.mxu0 %vm144_vm1, %v1024_v11 }
 0x1a8   :  { %v170_v34 = vpop.f32.mrf.mxu1 }
 0x1a9   :  { %v1070_v35 = vadd.f32 %v170_v34, %v138_v25 }
 0x1ab   :  { %v282_v38 = vsel %vm281_vm2, %v1070_v35, -inf }
 0x1af   :  { %v173_v32 = vpop.f32.mrf.mxu3 }
 0x1b0   :  { %v174_v49 = vadd.f32 %v173_v32, %v139_v29 }
 0x1b2   :  { %v285_v50 = vsel %vm281_vm2, %v174_v49, -inf }
 0x207   :  { %v205_v26 = vpop.f32.mrf.mxu2 }
 0x208   :  { %v206_v27 = vadd.f32 %v205_v26, %v138_v25  ;;  %v761_v26 = vpack.i.bf16 %v1035_v15, %v1026_v12 }
 0x20a   :  { %v288_v28 = vsel %vm281_vm2, %v206_v27, -inf }
 0x20b   :  { %289 = vmax.xlane.f32.xlu2 %v288_v28 }
 0x20f   :  { %v208_v30 = vpop.f32.mrf.mxu2 }
 0x210   :  { %v209_v31 = vadd.f32 %v208_v30, %v139_v29  ;;  %v771_v30 = vpack.i.bf16 %v1012_v8, %v1015_v10 }
 0x212   :  { %v291_v33 = vsel %vm281_vm2, %v209_v31, -inf }
 0x213   :  { %292 = vmax.xlane.f32.xlu1 %v291_v33 }
 0x219   :  { %v240_v36 = vpop.f32.mrf.mxu3 }
 0x21a   :  { %v241_v37 = vadd.f32 %v240_v36, %v138_v25 }
 0x21b   :  { %283 = vmax.xlane.f32.xlu1 %v282_v38  ;;  %v275_v39 = vpop.f32.mrf.mxu0 }
 0x21c   :  { %v276_v40 = vadd.f32 %v275_v39, %v138_v25  ;;  %v294_v41 = vsel %vm281_vm2, %v241_v37, -inf  ;;  %v756_v25 = vpack.i.bf16 %v1037_v16, %v1029_v13 }
 0x21d   :  { %295 = vmax.xlane.f32.xlu0 %v294_v41 }
 0x21e   :  { %v300_v42 = vsel %vm281_vm2, %v276_v40, -inf }
 0x21f   :  { %301 = vmax.xlane.f32.xlu2 %v300_v42 }
 0x221   :  { %v243_v43 = vpop.f32.mrf.mxu3 }
 0x222   :  { %v244_v44 = vadd.f32 %v243_v43, %v139_v29 }
 0x223   :  { %v278_v45 = vpop.f32.mrf.mxu0 }
 0x224   :  { %v279_v46 = vadd.f32 %v278_v45, %v139_v29  ;;  %v297_v48 = vsel %vm281_vm2, %v244_v44, -inf }
 0x226   :  { %v303_v47 = vsel %vm281_vm2, %v279_v46, -inf }
 0x227   :  { %304 = vmax.xlane.f32.xlu0 %v303_v47  ;;  %298 = vmax.xlane.f32.xlu2 %v297_v48 }
 0x22f   :  { %286 = vmax.xlane.f32.xlu0 %v285_v50 }
 0x27e   :  { %v290_v51 = vpop.xlane.xlu2 %289 }
 0x27f   :  { %v308_v52 = vsub.f32 %v206_v27, %v290_v51  ;;  %v766_v27 = vpack.i.bf16 %v1032_v14, %v1024_v11 }
 0x281   :  { %v318_v53 = vmul.f32 1.442695, %v308_v52 }
 0x283   :  { %778 = vpow2.f32 %v318_v53 }
 0x286   :  { %v293_v62 = vpop.xlane.xlu1 %292 }
 0x287   :  { %v309_v6 = vsub.f32 %v209_v31, %v293_v62 }
 0x289   :  { %v1079_v54 = vpop.eup %778  ;;  %v320_v18 = vmul.f32 1.442695, %v309_v6 }
 0x28a   :  { %v336_v55 = vsel %vm281_vm2, %v1079_v54, 0.0 }
 0x28b   :  { %337 = vadd.xlane.f32.xlu2 %v336_v55 }
 0x28e   :  { %v284_v28 = vpop.xlane.xlu1 %283 }
 0x28f   :  { %v306_v29 = vsub.f32 %v1070_v35, %v284_v28 }
 0x290   :  { %v296_v56 = vpop.xlane.xlu0 %295 }
 0x291   :  { %v310_v57 = vsub.f32 %v241_v37, %v296_v56  ;;  %v314_v31 = vmul.f32 1.442695, %v306_v29 }
 0x292   :  { %v302_v58 = vpop.xlane.xlu2 %301 }
 0x293   :  { %v322_v59 = vmul.f32 1.442695, %v310_v57  ;;  %v312_v60 = vsub.f32 %v276_v40, %v302_v58 }
 0x295   :  { %780 = vpow2.f32 %v322_v59  ;;  %v326_v61 = vmul.f32 1.442695, %v312_v60 }
 0x297   :  { %782 = vpow2.f32 %v326_v61 }
 0x29a   :  { %v305_v63 = vpop.xlane.xlu0 %304  ;;  %v299_v0 = vpop.xlane.xlu2 %298 }
 0x29b   :  { %v1083_v1 = vpop.eup %780  ;;  %v313_v2 = vsub.f32 %v279_v46, %v305_v63  ;;  %v311_v3 = vsub.f32 %v244_v44, %v299_v0 }
 0x29c   :  { %v342_v4 = vsel %vm281_vm2, %v1083_v1, 0.0 }
 0x29d   :  { %v1087_v5 = vpop.eup %782  ;;  %v328_v7 = vmul.f32 1.442695, %v313_v2  ;;  %v324_v9 = vmul.f32 1.442695, %v311_v3  ;;  %343 = vadd.xlane.f32.xlu1 %v342_v4 }
 0x29e   :  { %v348_v17 = vsel %vm281_vm2, %v1087_v5, 0.0 }
 0x29f   :  { %784 = vpow2.f32 %v328_v7  ;;  %349 = vadd.xlane.f32.xlu0 %v348_v17 }
 0x2a0   :  { %786 = vpow2.f32 %v324_v9 }
 0x2a1   :  { %788 = vpow2.f32 %v320_v18 }
 0x2a2   :  { %790 = vpow2.f32 %v314_v31  ;;  %v287_v13 = vpop.xlane.xlu0 %286 }
 0x2a3   :  { %v307_v32 = vsub.f32 %v174_v49, %v287_v13 }
 0x2a5   :  { %v1091_v19 = vpop.eup %784  ;;  %v316_v15 = vmul.f32 1.442695, %v307_v32 }
 0x2a6   :  { %v1093_v20 = vpop.eup %786  ;;  %v351_v21 = vsel %vm281_vm2, %v1091_v19, 0.0 }
 0x2a7   :  { %352 = vadd.xlane.f32.xlu2 %v351_v21  ;;  %v345_v22 = vsel %vm281_vm2, %v1093_v20, 0.0  ;;  %v1099_v23 = vpop.eup %788  ;;  %792 = vpow2.f32 %v316_v15 }
 0x2a8   :  { %346 = vadd.xlane.f32.xlu1 %v345_v22  ;;  %v339_v24 = vsel %vm281_vm2, %v1099_v23, 0.0  ;;  %v1112_v16 = vpop.eup %790 }
 0x2a9   :  { %v330_v12 = vsel %vm281_vm2, %v1112_v16, 0.0 }
 0x2ad   :  { %v1116_v11 = vpop.eup %792 }
 0x2ae   :  { %v333_v14 = vsel %vm281_vm2, %v1116_v11, 0.0 }
 0x2af   :  { %340 = vadd.xlane.f32.xlu2 %v339_v24 }
 0x2b3   :  { %757 = vrot.lane.b32.xlu0 %v756_v25, %s948_s17 }
 0x2c1   :  { %762 = vrot.lane.b32.xlu1 %v761_v26, %s948_s17 }
 0x2c7   :  { %767 = vrot.lane.b32.xlu2 %v766_v27, %s948_s17 }
 0x2cf   :  { %772 = vrot.lane.b32.xlu2 %v771_v30, %s948_s17 }
 0x2dd   :  { %331 = vadd.xlane.f32.xlu0 %v330_v12 }
 0x2eb   :  { %334 = vadd.xlane.f32.xlu1 %v333_v14 }
 0x2fe   :  { %v338_v8 = vpop.xlane.xlu2 %337 }
 0x2ff   :  { %794 = vrcp.f32 %v338_v8  ;;  %v393_v52 = vand.u32 2147483648, %v338_v8  ;;  %vm387_vm5 = vweird.f32 %v338_v8  ;;  %v391_v56 = vand.u32 2147483647, %v338_v8 }
 0x301   :  { %v394_v4 = vor.u32 1.1754944e-38, %v393_v52  ;;  %vm392_vm9 = vcmp.eq.f32.partialorder %v391_v56, 8.507059e+37 }
 0x305   :  { %v795_v34 = vpop.eup %794 }
 0x306   :  { %v383_v35 = vmul.f32 %v795_v34, %v338_v8  ;;  %vm388_vm3 = vweird.f32 %v795_v34 }
 0x307   :  { %vm1142_vm7 = vmor %vm387_vm5, %vm388_vm3 }
 0x308   :  { %v384_v39 = vsub.f32 1.0, %v383_v35 }
 0x30a   :  { %v385_v43 = vmul.f32 %v795_v34, %v384_v39 }
 0x30c   :  { %v386_v50 = vadd.f32 %v795_v34, %v385_v43 }
 0x30e   :  { %v390_v0 = vsel %vm1142_vm7, %v795_v34, %v386_v50 }
 0x30f   :  { %v395_v18 = vsel %vm392_vm9, %v394_v4, %v390_v0 }
 0x310   :  { %v1120_v33 = vpop.xlane.xlu1 %343 }
 0x311   :  { %v421_v28 = vand.u32 2147483648, %v1120_v33  ;;  %vm415_vm13 = vweird.f32 %v1120_v33  ;;  %v419_v31 = vand.u32 2147483647, %v1120_v33 }
 0x312   :  { %v350_v10 = vpop.xlane.xlu0 %349 }
 0x313   :  { %796 = vrcp.f32 %v350_v10  ;;  %vm443_vm6 = vweird.f32 %v350_v10  ;;  %v449_v57 = vand.u32 2147483648, %v350_v10  ;;  %v447_v60 = vand.u32 2147483647, %v350_v10 }
 0x314   :  { %798 = vrcp.f32 %v1120_v33  ;;  %v422_v35 = vor.u32 1.1754944e-38, %v421_v28 }
 0x315   :  { %v450_v17 = vor.u32 1.1754944e-38, %v449_v57  ;;  %vm448_vm10 = vcmp.eq.f32.partialorder %v447_v60, 8.507059e+37 }
 0x319   :  { %v797_v36 = vpop.eup %796 }
 0x31a   :  { %v439_v37 = vmul.f32 %v797_v36, %v350_v10  ;;  %v1123_v38 = vpop.xlane.xlu2 %352  ;;  %v1128_v41 = vpop.eup %798  ;;  %vm444_vm4 = vweird.f32 %v797_v36 }
 0x31b   :  { %800 = vrcp.f32 %v1123_v38  ;;  %v1126_v40 = vpop.xlane.xlu1 %346  ;;  %v411_v44 = vmul.f32 %v1128_v41, %v1120_v33  ;;  %vm1151_vm8 = vmor %vm443_vm6, %vm444_vm4  ;;  %vm416_vm11 = vweird.f32 %v1128_v41  ;;  %v463_v13 = vand.u32 2147483648, %v1123_v38 }
 0x31c   :  { %v440_v42 = vsub.f32 1.0, %v439_v37  ;;  %802 = vrcp.f32 %v1126_v40  ;;  %vm1170_vm14 = vmor %vm415_vm13, %vm416_vm11  ;;  %vm457_vm15 = vweird.f32 %v1123_v38  ;;  %v461_v8 = vand.u32 2147483647, %v1123_v38 }
 0x31d   :  { %v412_v51 = vsub.f32 1.0, %v411_v44  ;;  %vm420_vm4 = vcmp.eq.f32.partialorder %v419_v31, 8.507059e+37  ;;  %vm429_vm5 = vweird.f32 %v1126_v40  ;;  %v468_v37 = vmul.f32 %v1079_v54, %v395_v18 }
 0x31e   :  { %v441_v45 = vmul.f32 %v797_v36, %v440_v42  ;;  %vm462_vm6 = vcmp.eq.f32.partialorder %v461_v8, 8.507059e+37  ;;  %v648_v8 = vld [vmem:[#allocation8 + $0x18] sm:$0xff] }
 0x31f   :  { %v413_v2 = vmul.f32 %v1128_v41, %v412_v51 }
 0x320   :  { %v442_v53 = vadd.f32 %v797_v36, %v441_v45 }
 0x321   :  { %v1133_v46 = vpop.eup %800  ;;  %v414_v25 = vadd.f32 %v1128_v41, %v413_v2 }
 0x322   :  { %v453_v47 = vmul.f32 %v1133_v46, %v1123_v38  ;;  %v1137_v48 = vpop.xlane.xlu2 %340  ;;  %v1139_v49 = vpop.eup %802  ;;  %v446_v6 = vsel %vm1151_vm8, %v797_v36, %v442_v53  ;;  %vm458_vm12 = vweird.f32 %v1133_v46  ;;  %v464_v36 = vor.u32 1.1754944e-38, %v463_v13 }
 0x323   :  { %804 = vrcp.f32 %v1137_v48  ;;  %v425_v61 = vmul.f32 %v1139_v49, %v1126_v40  ;;  %v451_v26 = vsel %vm448_vm10, %v450_v17, %v446_v6  ;;  %v418_v10 = vsel %vm1170_vm14, %v1128_v41, %v414_v25  ;;  %vm1182_vm3 = vmor %vm457_vm15, %vm458_vm12 }
 0x324   :  { %v454_v55 = vsub.f32 1.0, %v453_v47  ;;  %v472_v14 = vmul.f32 %v1087_v5, %v451_v26  ;;  %v423_v38 = vsel %vm420_vm4, %v422_v35, %v418_v10  ;;  %vm430_vm7 = vweird.f32 %v1139_v49  ;;  %v646_v10 = vld [vmem:[#allocation8 + $0x8] sm:$0xff] }
 0x325   :  { %v758_v58 = vpop.permute.xlu0 %757  ;;  %v426_v21 = vsub.f32 1.0, %v425_v61  ;;  %v407_v47 = vand.u32 2147483648, %v1137_v48  ;;  %vm401_vm9 = vweird.f32 %v1137_v48  ;;  %v470_v51 = vmul.f32 %v1083_v1, %v423_v38  ;;  %vm1203_vm10 = vmor %vm429_vm5, %vm430_vm7 }
 0x326   :  { %v760_v62 = vunpack.i.h.bf16 %v758_v58  ;;  %v759_v63 = vunpack.i.l.bf16 %v758_v58  ;;  %v455_v7 = vmul.f32 %v1133_v46, %v454_v55  ;;  %v405_v52 = vand.u32 2147483647, %v1137_v48 }
 0x327   :  { %v427_v15 = vmul.f32 %v1139_v49, %v426_v21  ;;  %v433_v55 = vand.u32 2147483647, %v1126_v40 }
 0x328   :  { %535 = vmatpush.msra.mxu2 %v759_v63  ;;  %570 = vmatpush.msra.mxu3 %v760_v62  ;;  %v456_v30 = vadd.f32 %v1133_v46, %v455_v7  ;;  %vm406_vm12 = vcmp.eq.f32.partialorder %v405_v52, 8.507059e+37 }
 0x329   :  { %v1158_v9 = vpop.eup %804  ;;  %v428_v41 = vadd.f32 %v1139_v49, %v427_v15  ;;  %vm434_vm13 = vcmp.eq.f32.partialorder %v433_v55, 8.507059e+37 }
 0x32a   :  { %v397_v22 = vmul.f32 %v1158_v9, %v1137_v48  ;;  %v768_v24 = vpop.permute.xlu2 %767  ;;  %v460_v5 = vsel %vm1182_vm3, %v1133_v46, %v456_v30  ;;  %vm402_vm8 = vweird.f32 %v1158_v9  ;;  %v435_v46 = vand.u32 2147483648, %v1126_v40 }
 0x32b   :  { %v769_v27 = vunpack.i.l.bf16 %v768_v24  ;;  %v770_v32 = vunpack.i.h.bf16 %v768_v24  ;;  %v465_v44 = vsel %vm462_vm6, %v464_v36, %v460_v5  ;;  %vm403_vm11 = vmor %vm401_vm9, %vm402_vm8  ;;  %v432_v48 = vsel %vm1203_vm10, %v1139_v49, %v428_v41  ;;  %v777_v5 = vld [vmem:[%s1249_s4] ss:$0 sm:$0xff]  ;;  %s952_s4 = smov [#allocation10]  }
 0x32c   :  { %v398_v29 = vsub.f32 1.0, %v397_v22  ;;  %v473_v57 = vmul.f32 %v1091_v19, %v465_v44  ;;  %v436_v58 = vor.u32 1.1754944e-38, %v435_v46  ;;  %v408_v40 = vor.u32 1.1754944e-38, %v407_v47  ;;  %s690_s23 = sshll.u32 %s952_s4, 4  ;;  %s691_s23 = int_to_ptr.vmem [resolvable:$true] %s690_s23 }
 0x32d   :  { %605 = vmatpush.msra.mxu0 %v769_v27  ;;  %vm642_vm9 = vcmask 195584  }
 0x32e   :  { %v399_v33 = vmul.f32 %v1158_v9, %v398_v29  ;;  %v437_v59 = vsel %vm434_vm13, %v436_v58, %v432_v48 }
 0x32f   :  { %606 = vmatpush.msra.mxu0 %v770_v32  ;;  %v471_v61 = vmul.f32 %v1093_v20, %v437_v59 }
 0x330   :  { %731 = vmatmul.msk.f32.vlgmr.msra.gmra.mxu0 %vm281_vm2, %v472_v14  ;;  %v400_v45 = vadd.f32 %v1158_v9, %v399_v33  ;;  %v645_v33 = vld [vmem:[#allocation8] sm:$0xff] }
 0x332   :  { %v773_v39 = vpop.permute.xlu2 %772  ;;  %v404_v1 = vsel %vm403_vm11, %v1158_v9, %v400_v45 }
 0x333   :  { %v763_v42 = vpop.permute.xlu1 %762  ;;  %v774_v43 = vunpack.i.l.bf16 %v773_v39  ;;  %v775_v56 = vunpack.i.h.bf16 %v773_v39  ;;  %v409_v19 = vsel %vm406_vm12, %v408_v40, %v404_v1 }
 0x334   :  { %v765_v50 = vunpack.i.h.bf16 %v763_v42  ;;  %v764_v54 = vunpack.i.l.bf16 %v763_v42  ;;  %v469_v60 = vmul.f32 %v1099_v23, %v409_v19 }
 0x335   :  { %500 = vmatpush.msrb.mxu1 %v774_v43 }
 0x336   :  { %536 = vmatpush.msra.mxu2 %v764_v54  ;;  %571 = vmatpush.msra.mxu3 %v765_v50 }
 0x337   :  { %727 = vmatmul.msk.f32.vlgmr.msra.gmra.mxu2 %vm281_vm2, %v468_v37  ;;  %729 = vmatmul.msk.f32.vlgmr.msra.gmra.mxu3 %vm281_vm2, %v470_v51 }
 0x338   :  { %501 = vmatpush.msrb.mxu1 %v775_v56  ;;  %732 = vmatmul.msk.f32.gmra.mxu0 %vm281_vm2, %v473_v57 }
 0x33a   :  { %673 = vmatpush.msra.mxu1 %v648_v8 }
 0x33f   :  { %728 = vmatmul.msk.f32.gmra.mxu2 %vm281_vm2, %v469_v60  ;;  %730 = vmatmul.msk.f32.gmra.mxu3 %vm281_vm2, %v471_v61 }
 0x350   :  { %v332_v62 = vpop.xlane.xlu0 %331 }
 0x351   :  { %806 = vrcp.f32 %v332_v62  ;;  %v365_v2 = vand.u32 2147483648, %v332_v62  ;;  %v363_v4 = vand.u32 2147483647, %v332_v62  ;;  %vm359_vm15 = vweird.f32 %v332_v62 }
 0x353   :  { %v366_v23 = vor.u32 1.1754944e-38, %v365_v2  ;;  %vm364_vm4 = vcmp.eq.f32.partialorder %v363_v4, 8.507059e+37 }
 0x357   :  { %v807_v49 = vpop.eup %806 }
 0x358   :  { %v355_v63 = vmul.f32 %v807_v49, %v332_v62  ;;  %vm360_vm14 = vweird.f32 %v807_v49 }
 0x359   :  { %vm361_vm3 = vmor %vm359_vm15, %vm360_vm14 }
 0x35a   :  { %v356_v0 = vsub.f32 1.0, %v355_v63 }
 0x35c   :  { %v357_v3 = vmul.f32 %v807_v49, %v356_v0 }
 0x35e   :  { %v358_v6 = vadd.f32 %v807_v49, %v357_v3  ;;  %v335_v7 = vpop.xlane.xlu1 %334 }
 0x35f   :  { %808 = vrcp.f32 %v335_v7  ;;  %v379_v24 = vand.u32 2147483648, %v335_v7  ;;  %v377_v26 = vand.u32 2147483647, %v335_v7  ;;  %vm373_vm6 = vweird.f32 %v335_v7 }
 0x360   :  { %v362_v20 = vsel %vm361_vm3, %v807_v49, %v358_v6 }
 0x361   :  { %v367_v9 = vsel %vm364_vm4, %v366_v23, %v362_v20  ;;  %v380_v28 = vor.u32 1.1754944e-38, %v379_v24  ;;  %vm378_vm8 = vcmp.eq.f32.partialorder %v377_v26, 8.507059e+37 }
 0x362   :  { %v466_v17 = vmul.f32 %v1112_v16, %v367_v9 }
 0x364   :  { %725 = vmatmul.msk.f32.vlgmr.msrb.gmra.mxu1 %vm281_vm2, %v466_v17 }
 0x365   :  { %v809_v18 = vpop.eup %808 }
 0x366   :  { %v369_v21 = vmul.f32 %v809_v18, %v335_v7  ;;  %vm374_vm5 = vweird.f32 %v809_v18 }
 0x367   :  { %vm375_vm7 = vmor %vm373_vm6, %vm374_vm5 }
 0x368   :  { %v370_v22 = vsub.f32 1.0, %v369_v21 }
 0x36a   :  { %v371_v25 = vmul.f32 %v809_v18, %v370_v22 }
 0x36c   :  { %v372_v27 = vadd.f32 %v809_v18, %v371_v25 }
 0x36e   :  { %v376_v29 = vsel %vm375_vm7, %v809_v18, %v372_v27 }
 0x36f   :  { %v381_v30 = vsel %vm378_vm8, %v380_v28, %v376_v29 }
 0x370   :  { %v467_v31 = vmul.f32 %v1116_v11, %v381_v30  ;;  %v647_v11 = vld [vmem:[#allocation8 + $0x10] sm:$0xff] }
 0x371   :  { %674 = vmatpush.msra.mxu1 %v647_v11 }
 0x372   :  { %726 = vmatmul.msk.f32.gmra.mxu1 %vm281_vm2, %v467_v31 }
 0x373   :  { %675 = vmatpush.msra.mxu1 %v646_v10 }
 0x375   :  { %676 = vmatpush.msra.mxu1 %v645_v33 }
 0x3ad   :  { %v608_v16 = vpop.f32.mrf.mxu0 }
 0x3ae   :  { %632 = vrot.lane.b32.xlu2 %v608_v16, %s949_s18 }
 0x3b5   :  { %v611_v13 = vpop.f32.mrf.mxu0 }
 0x3b6   :  { %634 = vrot.lane.b32.xlu1 %v611_v13, %s949_s18 }
 0x3ba   :  { %v538_v32 = vpop.f32.mrf.mxu2  ;;  %v573_v12 = vpop.f32.mrf.mxu3 }
 0x3bb   :  { %616 = vrot.lane.b32.xlu2 %v538_v32, %s940_s27 }
 0x3c2   :  { %v541_v15 = vpop.f32.mrf.mxu2  ;;  %v576_v14 = vpop.f32.mrf.mxu3 }
 0x3c3   :  { %624 = vrot.lane.b32.xlu2 %v573_v12, %s950_s19  ;;  %618 = vrot.lane.b32.xlu0 %v541_v15, %s940_s27 }
 0x3cb   :  { %626 = vrot.lane.b32.xlu2 %v576_v14, %s950_s19 }
 0x3d3   :  { %652 = vrot.lane.b32.xlu2 %v777_v5, %s951_s22 }
 0x3e1   :  { %v503_v36 = vpop.f32.mrf.mxu1 }
 0x3ef   :  { %v506_v42 = vpop.f32.mrf.mxu1 }
 0x408   :  { %v633_v34 = vpop.permute.xlu2 %632 }
 0x415   :  { %v617_v35 = vpop.permute.xlu2 %616 }
 0x416   :  { %v638_v37 = vsel %vm144_vm1, %v503_v36, %v617_v35 }
 0x41d   :  { %v625_v38 = vpop.permute.xlu2 %624 }
 0x41e   :  { %v640_v39 = vsel %vm281_vm2, %v638_v37, %v625_v38 }
 0x41f   :  { %v643_v41 = vsel %vm642_vm9, %v640_v39, %v633_v34 }
 0x420   :  { %733 = vmatmul.msk.f32.vlgmr.msra.gmra.mxu1 %vm94_vm0, %v643_v41 }
 0x425   :  { %v627_v44 = vpop.permute.xlu2 %626 }
 0x428   :  { %v635_v46 = vpop.permute.xlu1 %634 }
 0x42d   :  { %v653_v54 = vpop.permute.xlu2 %652 }
 0x435   :  { %v619_v43 = vpop.permute.xlu0 %618 }
 0x436   :  { %v639_v45 = vsel %vm144_vm1, %v506_v42, %v619_v43 }
 0x437   :  { %v641_v47 = vsel %vm281_vm2, %v639_v45, %v627_v44 }
 0x438   :  { %v644_v50 = vsel %vm642_vm9, %v641_v47, %v635_v46 }
 0x439   :  { %734 = vmatmul.msk.f32.gmra.mxu1 %vm94_vm0, %v644_v50 }
 0x49d   :  { %v678_v51 = vpop.f32.mrf.mxu1 }
 0x49e   :  { %v679_v52 = vadd.f32 %v678_v51, %v653_v54 }
 0x4a0   :  { %684 = vst.msk [vmem:[#allocation10] sm:$0xff] %vm94_vm0, %v679_v52 }
 0x4b6   :  { %v681_v53 = vpop.f32.mrf.mxu1 }
 0x4b7   :  { %v682_v55 = vadd.f32 %v681_v53, %v653_v54 }
 0x4b9   :  { %685 = vst.msk [vmem:[#allocation10 + $0x8] sm:$0xff] %vm94_vm0, %v682_v55 }
 0x4ba   :  { %698 = dma.vmem_to_hbm [thread:$0]  %s691_s23, 256, %s693_s28, [#allocation4], %s939_s26, %s939_s26, %s940_s27  }
 0x4bb   :  { %936 = dma.done.wait [#allocation4], 256  }
 0x4bc   :  { %937 = vsyncadd [#allocation4], 4294967040 }
 0x4bd   :  { %703 = vsyncpa [#allocation3], 1 }
 0x4be   :  { %704 = vsyncpa [#allocation6], 1 }
 0x4bf   :  { %705 = vsyncpa [#allocation9], 1 }
 0x4c0   :  { %706 = vsyncpa [#allocation4], 1 }

</bundles_post_ra>
